<compile_context>
chip_gen: v5e
topology: v5e:2x2
jax: 0.10.0
libtpu: 0.0.40
codegen_flags: <defaults>
</compile_context>

<pallas_src>
import jax
import jax.numpy as jnp
from jax import lax
from jax.experimental import pallas as pl
from jax.experimental.pallas import tpu as pltpu


def attention_kernel(x_ref, w_ref, o_ref):
    # x_ref: (TB, P) f32, w_ref: (G, P) f32, o_ref: (TB, D) f32, P = G * D
    x = x_ref[...]
    w = w_ref[...]

    # --- deferred l2_norm: per-row inverse norm (EUP rsqrt on a (TB,1) vector) ---
    inv = lax.rsqrt(jnp.sum(x * x, axis=1, keepdims=True) + 1e-12)      # (TB, 1)

    # --- attention logits of the *normalized* x:  (x @ w.T) * inv  (NT contraction,
    #     no transpose/relayout of w; per-row scalar applied to the tiny (TB,G) tile) ---
    logits = lax.dot_general(
        x, w, dimension_numbers=(((1,), (1,)), ((), ())),
        preferred_element_type=jnp.float32) * inv                        # (TB, G)

    # --- softmax over groups (small last dim, exact) ---
    m = jnp.max(logits, axis=-1, keepdims=True)
    e = jnp.exp(logits - m)
    a = e / jnp.sum(e, axis=-1, keepdims=True)                           # (TB, G)

    # --- grouped weighted sum on raw x; apply inv once at the end ---
    G = w.shape[0]
    D = o_ref.shape[1]
    acc = x[:, 0:D] * a[:, 0:1]
    for g in range(1, G):                                                # static, small (G=4)
        acc = acc + x[:, g * D:(g + 1) * D] * a[:, g:g + 1]
    o_ref[...] = (acc * inv).astype(o_ref.dtype)


def attention_forward(x, w, *, block_b=None):
    B, P = x.shape
    G, Pw = w.shape
    assert Pw == P, "weight pre_dim mismatch"
    D = P // G
    assert G * D == P, "pre_dim must be divisible by dim (groups * dim == pre_dim)"

    # Batch tile: multiple of 8 (sublane) or the full batch; cap keeps the
    # double-buffered tiles comfortably inside the scoped VMEM defaults on
    # v5e (16 MiB) / v6e (32 MiB) / v7x (32 MiB) without raising vmem_limit_bytes.
    if block_b is None:
        block_b = B if B <= 512 else 512
    block_b = min(block_b, B)

    grid_b = pl.cdiv(B, block_b)

    return pl.pallas_call(
        attention_kernel,
        out_shape=jax.ShapeDtypeStruct((B, D), x.dtype),
        grid=(grid_b,),
        in_specs=[
            pl.BlockSpec((block_b, P), lambda i: (i, 0)),   # batch tile of x
            pl.BlockSpec((G, P), lambda i: (0, 0)),         # weights resident across the grid
        ],
        out_specs=pl.BlockSpec((block_b, D), lambda i: (i, 0)),
        compiler_params=pltpu.CompilerParams(
            dimension_semantics=("parallel",)),              # megacore shard over batch tiles
    )(x, w)


def attention_reference(x, w):
    normp = jnp.sum(x * x, axis=1, keepdims=True) + 1e-12
    xn = x / jnp.sqrt(normp)
    a = jax.nn.softmax(xn @ w.T, axis=-1)
    G, P = w.shape
    D = P // G
    xg = xn.reshape(x.shape[0], G, D)
    return jnp.sum(xg * a[..., None], axis=1)


if __name__ == "__main__":
    # Small shapes consistent with the module: pre_dim / dim = 4 groups.
    B, pre_dim, dim = 64, 512, 128
    groups = pre_dim // dim

    key = jax.random.PRNGKey(0)
    kx, kw = jax.random.split(key)
    x = jax.random.normal(kx, (B, pre_dim), dtype=jnp.float32)
    # Deterministic init mimicking nn.Linear default scale (uniform +/- 1/sqrt(fan_in)).
    bound = 1.0 / (pre_dim ** 0.5)
    w = jax.random.uniform(kw, (groups, pre_dim), dtype=jnp.float32,
                           minval=-bound, maxval=bound)

    # Use a small batch tile here to exercise the multi-step, pipelined grid.
    out = attention_forward(x, w, block_b=16)
    out = jax.block_until_ready(out)

    ref = attention_reference(x, w)
    assert out.shape == (B, dim)
    assert jnp.allclose(out, ref, atol=1e-5, rtol=1e-5)

    print("KERNEL_OK")
</pallas_src>

<mosaic_0001>
module attributes {stable_mosaic.version = 11 : i64} {
  func.func @attention_kernel(%arg0: i32, %arg1: memref<16x512xf32, #tpu.memory_space<vmem>>, %arg2: memref<4x512xf32, #tpu.memory_space<vmem>>, %arg3: memref<16x128xf32, #tpu.memory_space<vmem>>) attributes {dimension_semantics = [#tpu.dimension_semantics<parallel>], iteration_bounds = array<i64: 4>, scalar_prefetch = 0 : i64, scratch_operands = 0 : i64, tpu.core_type = #tpu.core_type<tc>, window_params = [{transform_indices = @transform_0, window_bounds = array<i64: 16, 512>}, {pipeline_mode = #tpu.pipeline_mode<synchronous>, transform_indices = @transform_1, window_bounds = array<i64: 4, 512>}, {transform_indices = @transform_2, window_bounds = array<i64: 16, 128>}]} {
    %c0 = arith.constant 0 : index
    %c0_0 = arith.constant 0 : index
    %0 = vector.load %arg1[%c0, %c0_0] : memref<16x512xf32, #tpu.memory_space<vmem>>, vector<16x512xf32>
    %c0_1 = arith.constant 0 : index
    %c0_2 = arith.constant 0 : index
    %1 = vector.load %arg2[%c0_1, %c0_2] : memref<4x512xf32, #tpu.memory_space<vmem>>, vector<4x512xf32>
    %2 = arith.mulf %0, %0 : vector<16x512xf32>
    %cst = arith.constant dense<0.000000e+00> : vector<16xf32>
    %3 = vector.multi_reduction <add>, %2, %cst [1] : vector<16x512xf32> to vector<16xf32>
    %4 = vector.shape_cast %3 : vector<16xf32> to vector<16x1xf32>
    %cst_3 = arith.constant 9.99999996E-13 : f32
    %5 = vector.broadcast %cst_3 : f32 to vector<16x1xf32>
    %6 = arith.addf %4, %5 : vector<16x1xf32>
    %7 = math.rsqrt %6 : vector<16x1xf32>
    %cst_4 = arith.constant dense<0.000000e+00> : vector<16x4xf32>
    %8 = tpu.matmul %0, %1, %cst_4 {dimension_numbers = #tpu.dot_dimension_numbers<[1], [1], [0], [0], [0, 0, 1, 0], [], []>} : vector<16x512xf32>, vector<4x512xf32>, vector<16x4xf32> -> vector<16x4xf32>
    %9 = vector.broadcast %7 : vector<16x1xf32> to vector<16x4xf32>
    %10 = arith.mulf %8, %9 : vector<16x4xf32>
    %cst_5 = arith.constant dense<0xFF800000> : vector<16xf32>
    %11 = vector.multi_reduction <maximumf>, %10, %cst_5 [1] : vector<16x4xf32> to vector<16xf32>
    %12 = vector.shape_cast %11 : vector<16xf32> to vector<16x1xf32>
    %13 = vector.broadcast %12 : vector<16x1xf32> to vector<16x4xf32>
    %14 = arith.subf %10, %13 : vector<16x4xf32>
    %15 = math.exp %14 : vector<16x4xf32>
    %cst_6 = arith.constant dense<0.000000e+00> : vector<16xf32>
    %16 = vector.multi_reduction <add>, %15, %cst_6 [1] : vector<16x4xf32> to vector<16xf32>
    %17 = vector.shape_cast %16 : vector<16xf32> to vector<16x1xf32>
    %18 = vector.broadcast %17 : vector<16x1xf32> to vector<16x4xf32>
    %19 = arith.divf %15, %18 : vector<16x4xf32>
    %20 = vector.extract_strided_slice %0 {offsets = [0, 0], sizes = [16, 128], strides = [1, 1]} : vector<16x512xf32> to vector<16x128xf32>
    %21 = vector.extract_strided_slice %19 {offsets = [0, 0], sizes = [16, 1], strides = [1, 1]} : vector<16x4xf32> to vector<16x1xf32>
    %22 = vector.broadcast %21 : vector<16x1xf32> to vector<16x128xf32>
    %23 = arith.mulf %20, %22 : vector<16x128xf32>
    %24 = vector.extract_strided_slice %0 {offsets = [0, 128], sizes = [16, 128], strides = [1, 1]} : vector<16x512xf32> to vector<16x128xf32>
    %25 = vector.extract_strided_slice %19 {offsets = [0, 1], sizes = [16, 1], strides = [1, 1]} : vector<16x4xf32> to vector<16x1xf32>
    %26 = vector.broadcast %25 : vector<16x1xf32> to vector<16x128xf32>
    %27 = arith.mulf %24, %26 : vector<16x128xf32>
    %28 = arith.addf %23, %27 : vector<16x128xf32>
    %29 = vector.extract_strided_slice %0 {offsets = [0, 256], sizes = [16, 128], strides = [1, 1]} : vector<16x512xf32> to vector<16x128xf32>
    %30 = vector.extract_strided_slice %19 {offsets = [0, 2], sizes = [16, 1], strides = [1, 1]} : vector<16x4xf32> to vector<16x1xf32>
    %31 = vector.broadcast %30 : vector<16x1xf32> to vector<16x128xf32>
    %32 = arith.mulf %29, %31 : vector<16x128xf32>
    %33 = arith.addf %28, %32 : vector<16x128xf32>
    %34 = vector.extract_strided_slice %0 {offsets = [0, 384], sizes = [16, 128], strides = [1, 1]} : vector<16x512xf32> to vector<16x128xf32>
    %35 = vector.extract_strided_slice %19 {offsets = [0, 3], sizes = [16, 1], strides = [1, 1]} : vector<16x4xf32> to vector<16x1xf32>
    %36 = vector.broadcast %35 : vector<16x1xf32> to vector<16x128xf32>
    %37 = arith.mulf %34, %36 : vector<16x128xf32>
    %38 = arith.addf %33, %37 : vector<16x128xf32>
    %39 = vector.broadcast %7 : vector<16x1xf32> to vector<16x128xf32>
    %40 = arith.mulf %38, %39 : vector<16x128xf32>
    %c0_7 = arith.constant 0 : index
    %c0_8 = arith.constant 0 : index
    %41 = vector.load %arg3[%c0_7, %c0_8] : memref<16x128xf32, #tpu.memory_space<vmem>>, vector<16x128xf32>
    tpu.vector_store %arg3[%c0_7, %c0_8], %40 {strides = array<i32>} : memref<16x128xf32, #tpu.memory_space<vmem>>, vector<16x128xf32>,
    return
  }
  func.func @transform_0(%arg0: i32) -> (i32, i32) {
    %c0_i32 = arith.constant 0 : i32
    %c0_i32_0 = arith.constant 0 : i32
    return %arg0, %c0_i32 : i32, i32
  }
  func.func @transform_1(%arg0: i32) -> (i32, i32) {
    %c0_i32 = arith.constant 0 : i32
    %c0_i32_0 = arith.constant 0 : i32
    %c0_i32_1 = arith.constant 0 : i32
    return %c0_i32, %c0_i32_0 : i32, i32
  }
  func.func @transform_2(%arg0: i32) -> (i32, i32) {
    %c0_i32 = arith.constant 0 : i32
    %c0_i32_0 = arith.constant 0 : i32
    return %arg0, %c0_i32 : i32, i32
  }
}

</mosaic_0001>

<bundles_post_ra>
// kernel: tpu_custom_call.1
= control target key start
LH: loop header
LB: loop body
LE: loop exit
PB: predicated region body
PF: predicated region fallthrough
CT: control target
= control target key end

     0   :  { %7 = vsyncpa [#allocation3], 0  ;;  %s1000_s0 = inlined_call_operand.hbm [shape: f32[64,512], index: 0, kind: input, shape index: {}]   ;;  %s1001_s1 = inlined_call_operand.hbm [shape: f32[4,512], index: 1, kind: input, shape index: {}]   ;;  %s1002_s2 = inlined_call_operand.hbm [shape: f32[64,128], index: 2, kind: output, shape index: {}]  }
   0x1   :  { %9 = vsyncpa [#allocation3 + $0x1], 0 }
   0x2   :  { %10 = vsyncpa [#allocation6], 0 }
   0x3   :  { %11 = vsyncpa [#allocation4], 0 }
   0x4   :  { %13 = vsyncpa [#allocation4 + $0x1], 0  ;;  %s799_s9 = smov 0   ;;  %s801_s10 = smov 0  }
   0x5   :  { %s803_s11 = smov 0   ;;  %s805_s12 = smov 0  }
   0x6 LB: > { %s820_s13 = sadd.s32 4294967295, %s773_s12   ;;  %s539_s14 = sadd.s32 4294967294, %s773_s12   ;;  %s773_s12 = sphi %s805_s12, %s1012_s12   ;;  %s769_s11 = sphi %s803_s11, %s1011_s11   ;;  %s765_s10 = sphi %s801_s10, %s1010_s10   ;;  %s761_s9 = sphi %s799_s9, %s1009_s9  }
   0x7   : > { %s824_s15 = sadd.s32 1, %s773_s12   ;;  %s26_s16 = sadd.s32 1, %s769_s11 }
   0x8   : > { %s23_s17 = ssub.s32 %s773_s12, %s824_s15  ;;  %p33_p0 = scmp.ne.s32.totalorder %s769_s11, %s765_s10 }
   0x9   : > { %p24_p1 = scmp.eq.s32.totalorder %s23_s17, 0  ;;  %p34_p2 = scmp.eq.s32.totalorder %s773_s12, 0 }
   0xa   : > { %p39_p3 = scmp.ne.s32.totalorder %s765_s10, %s761_s9  ;;  %p40_p4 = scmp.eq.s32.totalorder %s820_s13, 0 }
   0xb   : > { %s836_s18 = scalar_select %p24_p1, %s769_s11, %s26_s16  }
   0xc   : > { %p838_p5 = por %p34_p2, %p33_p0  ;;  %p844_p6 = por %p40_p4, %p39_p3 }
   0xd   : > { %p84_p7 = scmp.eq.s32.totalorder %s820_s13, 3  ;;  %p90_p8 = scmp.eq.s32.totalorder %s539_s14, 3 }
   0xe   : > { %p540_p9 = scmp.ge.s32.totalorder %s773_s12, 1  ;;  %p97_p10 = scmp.lt.s32.totalorder %s773_s12, 5 }
   0xf   : > { %p851_p11 = por %p84_p7, %p33_p0  ;;  %p855_p12 = por %p90_p8, %p39_p3 }
  0x10   : > { %p859_p13 = pnand %p540_p9, %p97_p10  ;;  %s109_s26 = sshll.u32 %s1001_s1, 4  ;;  %s110_s26 = int_to_ptr.hbm [resolvable:$true] %s109_s26 }
  0x11   : > { %s775_s27 = smov [#allocation5]   ;;  %p580_p2 = scmp.lt.s32.totalorder %s773_s12, 4 }
  0x12   : > { %p567_p1 = pneg %p859_p13  ;;  %s111_s28 = sshll.u32 %s775_s27, 4  ;;  %s112_s28 = int_to_ptr.vmem [resolvable:$true] %s111_s28 }
  0x13   : > { %s122_s29 = sand.u32 1, %s769_s11   ;;  %p874_p3 = pnand %p580_p2, %p838_p5 }
  0x14   : > { %p568_p0 = pnand %p567_p1, %p40_p4  ;;  %s543_s3 = sshll.u32 %s122_s29, 6 }
  0x15   : > { %s557_s4 = sshll.u32 %s773_s12, 6  ;;  %s126_s14 = scalar_lea.vmem [#allocation2], %s543_s3 }
  0x16   : > { %570 = dma.hbm_to_vmem [thread:$0]  (!%p568_p0), %s110_s26, 256, %s112_s28, [#allocation6]  }
  0x17   : > { %s132_s7 = scalar_lea.hbm %s1000_s0, %s557_s4  ;;  %s135_s16 = sshll.u32 %s126_s14, 4  ;;  %s136_s16 = int_to_ptr.vmem [resolvable:$true] %s135_s16 }
  0x18   : > { %s133_s8 = sshll.u32 %s132_s7, 4  ;;  %s123_s17 = scalar_lea.sflag [#allocation3], %s122_s29  ;;  %s134_s8 = int_to_ptr.hbm [resolvable:$true] %s133_s8 }
  0x19   : > { %s673_s24 = sshra.s32 %s134_s8, 4  ;;  %p677_p7 = pneg %p874_p3  ;;  %s674_s24 = int_to_ptr.hbm [resolvable:$true] %s673_s24 }
  0x1a   : > { %s675_s19 = scalar_lea.hbm %s674_s24, 64  ;;  %s680_s27 = scalar_lea.hbm %s1000_s0, 256 }
  0x1b   : > { %p676_p5 = scmp.ne.s32.totalorder %s674_s24, %s675_s19  ;;  %p681_p10 = scmp.lt.s32.totalorder %s674_s24, %s1000_s0 }
  0x1c   : > { %p682_p1 = scmp.lt.s32.totalorder %s680_s27, %s675_s19 }
  0x1d   : > { %p678_p8 = pnand %p677_p7, %p676_p5 }
  0x1e   : > { %p683_p0 = por %p682_p1, %p681_p10 }
  0x1f   : > { %p679_p9 = pneg %p678_p8 }
  0x21   : > { %p684_p2 = pnand %p683_p0, %p679_p9 }
  0x23   : > { %687 = shalt.err (!%p684_p2)
}
  0x24   : > { %s776_s29 = smov 512   ;;  %s777_s3 = smov 32  }
  0x25   : > { %574 = dma.hbm_to_vmem [thread:$0]  (!%p874_p3), %s134_s8, 1024, %s136_s16, %s123_s17, %s776_s29, %s776_s29, %s777_s3  }
  0x26   : > { %147 = sbr.rel (%p859_p13) target bundleno = 604 (0x25c), region = 28  ;;  %s895_s5 = sand.u32 (!%p859_p13), 1, %s765_s10  }
  0x27   : > { %s548_s6 = sshll.u32 (!%p859_p13), %s895_s5, 6  ;;  %s150_s7 = scalar_lea.sflag (!%p859_p13), [#allocation3], %s895_s5 }
  0x28   : > { %s153_s14 = scalar_lea.vmem (!%p859_p13), [#allocation2], %s548_s6 }
  0x2b   : > { %748 = dma.done.wait (%p844_p6), %s150_s7, 1024  }
  0x2c   : > { %750 = vsyncadd (%p844_p6), %s150_s7, 4294966272 }
  0x2d   : > { %752 = dma.done.wait (%p40_p4), [#allocation6], 256  }
  0x2e   : > { %754 = vsyncadd (%p40_p4), [#allocation6], 4294967040  ;;  %v191_v0 = vld [vmem:[#allocation5 + $0x8] sm:$0xff]  ;;  %v907_v1 = vld [vmem:[%s153_s14] sm:$0xff]  ;;  %vm339_vm3 = vcmask 31744   ;;  %s558_s20 = sshll.u32 %s820_s13, 4 }
  0x2f   : > { %v909_v2 = vld [vmem:[%s153_s14 + $0x8] sm:$0xff]  ;;  %236 = vst [vmem:[#allocation1 + $0x10] ss:$2 sm:$0xff] %v191_v0  ;;  %v911_v3 = vld [vmem:[%s153_s14 + $0x10] sm:$0xff]  ;;  %v913_v4 = vld [vmem:[%s153_s14 + $0x18] sm:$0xff]  ;;  %v192_v5 = vmul.f32 %v907_v1, %v907_v1  ;;  %s550_s23 = sshll.u32 %s895_s5, 4  ;;  %s452_s16 = scalar_lea.hbm %s1002_s2, %s558_s20 }
  0x30   : > { %v193_v6 = vmul.f32 %v909_v2, %v909_v2  ;;  %v190_v7 = vld [vmem:[#allocation5] sm:$0xff]  ;;  %v194_v8 = vmul.f32 %v911_v3, %v911_v3  ;;  %v923_v10 = vld [vmem:[%s153_s14 + $0x28] sm:$0xff]  ;;  %v925_v11 = vld [vmem:[%s153_s14 + $0x30] sm:$0xff]  ;;  %v195_v12 = vmul.f32 %v913_v4, %v913_v4  ;;  %s179_s17 = scalar_lea.vmem [#allocation7], %s550_s23  ;;  %s455_s13 = sshll.u32 %s452_s16, 4  ;;  %s456_s13 = int_to_ptr.hbm [resolvable:$true] %s455_s13 }
  0x31   : > { %234 = vst [vmem:[#allocation1] ss:$2 sm:$0xff] %v190_v7  ;;  %v921_v9 = vld [vmem:[%s153_s14 + $0x20] sm:$0xff]  ;;  %v197_v15 = vmul.f32 %v923_v10, %v923_v10  ;;  %v198_v17 = vmul.f32 %v925_v11, %v925_v11  ;;  %v935_v19 = vld [vmem:[%s153_s14 + $0x38] sm:$0xff]  ;;  %s453_s24 = sshll.u32 %s179_s17, 4  ;;  %s441_s19 = scalar_lea.sflag [#allocation4], %s895_s5  ;;  %s454_s24 = int_to_ptr.vmem [resolvable:$true] %s453_s24 }
  0x32   : > { %v200_v13 = vadd.f32 %v193_v6, %v192_v5  ;;  %v196_v14 = vmul.f32 %v921_v9, %v921_v9  ;;  %v199_v25 = vmul.f32 %v935_v19, %v935_v19  ;;  %s717_s25 = sshra.s32 %s456_s13, 4  ;;  %s723_s4 = scalar_lea.hbm %s1002_s2, 64  ;;  %s718_s25 = int_to_ptr.hbm [resolvable:$true] %s717_s25 }
  0x33   : > { %s719_s26 = scalar_lea.hbm %s718_s25, 16  ;;  %p724_p3 = scmp.lt.s32.totalorder %s718_s25, %s1002_s2 }
  0x34   : > { %v201_v16 = vadd.f32 %v200_v13, %v194_v8  ;;  %v205_v18 = vadd.f32 %v197_v15, %v196_v14  ;;  %p720_p4 = scmp.ne.s32.totalorder %s718_s25, %s719_s26  ;;  %p725_p5 = scmp.lt.s32.totalorder %s723_s4, %s719_s26 }
  0x36   : > { %v202_v20 = vadd.f32 %v201_v16, %v195_v12  ;;  %v239_v21 = vld.sshfl [vmem:[#allocation1 + $0x10] sm:$0xff pattern:$0x75316420]  ;;  %v240_v22 = vld.sshfl [vmem:[#allocation1 + $0x18] sm:$0xff pattern:$0x75316420]  ;;  %v206_v26 = vadd.f32 %v205_v18, %v198_v17  ;;  %p721_p6 = pnand %p720_p4, %p851_p11  ;;  %p726_p7 = por %p725_p5, %p724_p3 }
  0x37   : > { %306 = vmatpush.xpose.msra.mxu2 %v239_v21  ;;  %329 = vmatpush.xpose.msra.mxu3 %v240_v22  ;;  %v778_v17 = vmov 2   ;;  %v779_v18 = vmov 1  }
  0x38   : > { %203 = vadd.xlane.f32.xlu0 %v202_v20  ;;  %v237_v23 = vld.sshfl [vmem:[#allocation1] sm:$0xff pattern:$0x75316420]  ;;  %v238_v24 = vld.sshfl [vmem:[#allocation1 + $0x8] sm:$0xff pattern:$0x75316420]  ;;  %v207_v27 = vadd.f32 %v206_v26, %v199_v25  ;;  %626 = vset.pattern.permute.xlu1 %v778_v17  ;;  %p722_p13 = pneg %p721_p6 }
  0x39   : > { %260 = vmatpush.xpose.msra.mxu0 %v237_v23  ;;  %283 = vmatpush.xpose.msra.mxu1 %v238_v24  ;;  %v780_v20 = vmov 0  }
  0x3a   : > { %307 = vmatmul.f32.vlgmr.msra.gmra.mxu2 %v911_v3  ;;  %330 = vmatmul.f32.vlgmr.msra.gmra.mxu3 %v913_v4  ;;  %p727_p8 = pnand %p726_p7, %p722_p13 }
  0x3b   : > { %625 = vset.pattern.permute.xlu2 %v779_v18  ;;  %624 = vset.pattern.permute.xlu0 %v780_v20 }
  0x3c   : > { %261 = vmatmul.f32.vlgmr.msra.gmra.mxu0 %v907_v1  ;;  %284 = vmatmul.f32.vlgmr.msra.gmra.mxu1 %v909_v2 }
  0x40   : > { %208 = vadd.xlane.f32.xlu0 %v207_v27 }
  0x42   : > { %310 = vmatmul.f32.gmra.mxu2 %v925_v11  ;;  %333 = vmatmul.f32.gmra.mxu3 %v935_v19 }
  0x44   : > { %264 = vmatmul.f32.gmra.mxu0 %v921_v9  ;;  %287 = vmatmul.f32.gmra.mxu1 %v923_v10 }
  0xab   : > { %v204_v28 = vpop.xlane.xlu0 %203 }
  0xac   : > { %v210_v29 = vadd.f32 1e-12, %v204_v28 }
  0xae   : > { %631 = vrsqrt.f32 %v210_v29  ;;  %vm218_vm1 = vweird.f32 %v210_v29 }
  0xb3   : > { %v209_v30 = vpop.xlane.xlu0 %208 }
  0xb4   : > { %v632_v31 = vpop.eup %631  ;;  %v211_v32 = vadd.f32 1e-12, %v209_v30 }
  0xb5   : > { %v213_v33 = vmul.f32 %v632_v31, %v210_v29  ;;  %vm219_vm0 = vweird.f32 %v632_v31 }
  0xb6   : > { %633 = vrsqrt.f32 %v211_v32  ;;  %vm220_vm2 = vmor %vm218_vm1, %vm219_vm0  ;;  %vm228_vm5 = vweird.f32 %v211_v32 }
  0xb7   : > { %v214_v34 = vmul.f32 %v632_v31, %v213_v33 }
  0xb9   : > { %v215_v35 = vmul.f32 0.5, %v214_v34  ;;  %v262_v36 = vpop.f32.mrf.mxu0  ;;  %v285_v37 = vpop.f32.mrf.mxu1 }
  0xba   : > { %v286_v39 = vadd.f32 %v285_v37, %v262_v36 }
  0xbb   : > { %v216_v38 = vsub.f32 1.5, %v215_v35 }
  0xbc   : > { %v634_v40 = vpop.eup %633 }
  0xbd   : > { %v223_v41 = vmul.f32 %v634_v40, %v211_v32  ;;  %v308_v42 = vpop.f32.mrf.mxu2  ;;  %v217_v43 = vmul.f32 %v632_v31, %v216_v38  ;;  %v331_v46 = vpop.f32.mrf.mxu3  ;;  %vm229_vm4 = vweird.f32 %v634_v40 }
  0xbe   : > { %v309_v45 = vadd.f32 %v308_v42, %v286_v39  ;;  %vm230_vm6 = vmor %vm228_vm5, %vm229_vm4 }
  0xbf   : > { %v224_v44 = vmul.f32 %v634_v40, %v223_v41  ;;  %v947_v51 = vsel %vm220_vm2, %v632_v31, %v217_v43 }
  0xc0   : > { %v332_v48 = vadd.f32 %v331_v46, %v309_v45  ;;  %v781_v45 = vmov 3  }
  0xc1   : > { %v225_v47 = vmul.f32 0.5, %v224_v44  ;;  %v265_v49 = vpop.f32.mrf.mxu0  ;;  %v288_v50 = vpop.f32.mrf.mxu1 }
  0xc2   : > { %v289_v53 = vadd.f32 %v288_v50, %v265_v49  ;;  %v337_v54 = vmul.f32 %v332_v48, %v947_v51 }
  0xc3   : > { %v226_v52 = vsub.f32 1.5, %v225_v47 }
  0xc4   : > { %v340_v55 = vsel %vm339_vm3, %v337_v54, -inf }
  0xc5   : > { %v311_v56 = vpop.f32.mrf.mxu2  ;;  %341 = vmax.xlane.f32.xlu1 %v340_v55  ;;  %v227_v57 = vmul.f32 %v634_v40, %v226_v52  ;;  %v334_v59 = vpop.f32.mrf.mxu3 }
  0xc6   : > { %v312_v58 = vadd.f32 %v311_v56, %v289_v53 }
  0xc7   : > { %v951_v61 = vsel %vm230_vm6, %v634_v40, %v227_v57 }
  0xc8   : > { %v335_v60 = vadd.f32 %v334_v59, %v312_v58 }
  0xca   : > { %v338_v62 = vmul.f32 %v335_v60, %v951_v61 }
  0xcc   : > { %v343_v63 = vsel %vm339_vm3, %v338_v62, -inf }
  0xcd   : > { %344 = vmax.xlane.f32.xlu1 %v343_v63 }
 0x138   : > { %v342_v0 = vpop.xlane.xlu1 %341 }
 0x139   : > { %v346_v5 = vsub.f32 %v337_v54, %v342_v0 }
 0x13b   : > { %v348_v6 = vmul.f32 1.442695, %v346_v5 }
 0x13d   : > { %635 = vpow2.f32 %v348_v6 }
 0x140   : > { %v345_v7 = vpop.xlane.xlu1 %344 }
 0x141   : > { %v347_v8 = vsub.f32 %v338_v62, %v345_v7 }
 0x143   : > { %v636_v12 = vpop.eup %635  ;;  %v350_v13 = vmul.f32 1.442695, %v347_v8 }
 0x144   : > { %v352_v14 = vsel %vm339_vm3, %v636_v12, 0.0 }
 0x145   : > { %637 = vpow2.f32 %v350_v13  ;;  %353 = vadd.xlane.f32.xlu2 %v352_v14 }
 0x14b   : > { %v638_v15 = vpop.eup %637 }
 0x14c   : > { %v355_v16 = vsel %vm339_vm3, %v638_v15, 0.0 }
 0x14d   : > { %356 = vadd.xlane.f32.xlu2 %v355_v16 }
 0x1b8   : > { %v354_v21 = vpop.xlane.xlu2 %353 }
 0x1b9   : > { %639 = vrcp.f32 %v354_v21  ;;  %v369_v26 = vand.u32 2147483648, %v354_v21  ;;  %v367_v28 = vand.u32 2147483647, %v354_v21  ;;  %vm363_vm8 = vweird.f32 %v354_v21 }
 0x1bb   : > { %v370_v31 = vor.u32 1.1754944e-38, %v369_v26  ;;  %vm368_vm10 = vcmp.eq.f32.partialorder %v367_v28, 8.507059e+37 }
 0x1bf   : > { %v640_v22 = vpop.eup %639 }
 0x1c0   : > { %v359_v23 = vmul.f32 %v640_v22, %v354_v21  ;;  %v357_v24 = vpop.xlane.xlu2 %356  ;;  %vm364_vm7 = vweird.f32 %v640_v22 }
 0x1c1   : > { %641 = vrcp.f32 %v357_v24  ;;  %vm365_vm9 = vmor %vm363_vm8, %vm364_vm7  ;;  %v384_v37 = vand.u32 2147483648, %v357_v24  ;;  %v382_v39 = vand.u32 2147483647, %v357_v24  ;;  %vm378_vm12 = vweird.f32 %v357_v24 }
 0x1c2   : > { %v360_v25 = vsub.f32 1.0, %v359_v23 }
 0x1c3   : > { %v385_v41 = vor.u32 1.1754944e-38, %v384_v37  ;;  %vm383_vm14 = vcmp.eq.f32.partialorder %v382_v39, 8.507059e+37 }
 0x1c4   : > { %v361_v27 = vmul.f32 %v640_v22, %v360_v25 }
 0x1c6   : > { %v362_v29 = vadd.f32 %v640_v22, %v361_v27 }
 0x1c7   : > { %v642_v30 = vpop.eup %641 }
 0x1c8   : > { %v374_v32 = vmul.f32 %v642_v30, %v357_v24  ;;  %v366_v33 = vsel %vm365_vm9, %v640_v22, %v362_v29  ;;  %vm379_vm11 = vweird.f32 %v642_v30 }
 0x1c9   : > { %v371_v34 = vsel %vm368_vm10, %v370_v31, %v366_v33  ;;  %vm380_vm13 = vmor %vm378_vm12, %vm379_vm11 }
 0x1ca   : > { %v375_v35 = vsub.f32 1.0, %v374_v32  ;;  %v372_v36 = vmul.f32 %v636_v12, %v371_v34 }
 0x1cc   : > { %v376_v38 = vmul.f32 %v642_v30, %v375_v35  ;;  %390 = vperm.xlu0 %624, %v372_v36   ;;  %413 = vperm.xlu1 %626, %v372_v36  }
 0x1cd   : > { %401 = vperm.xlu2 %625, %v372_v36  }
 0x1ce   : > { %v377_v40 = vadd.f32 %v642_v30, %v376_v38 }
 0x1d0   : > { %v381_v42 = vsel %vm380_vm13, %v642_v30, %v377_v40 }
 0x1d1   : > { %v386_v43 = vsel %vm383_vm14, %v385_v41, %v381_v42 }
 0x1d2   : > { %v387_v44 = vmul.f32 %v638_v15, %v386_v43 }
 0x1d4   : > { %630 = vset.pattern.permute.xlu0 %v781_v45  ;;  %627 = vset.pattern.permute.xlu1 %v780_v20 }
 0x1d5   : > { %405 = vperm.xlu2 %625, %v387_v44   ;;  %429 = vperm.xlu0 %630, %v387_v44  }
 0x1d6   : > { %395 = vperm.xlu1 %627, %v387_v44  }
 0x1dd   : > { %628 = vset.pattern.permute.xlu2 %v778_v17 }
 0x1de   : > { %417 = vperm.xlu2 %628, %v387_v44   ;;  %629 = vset.pattern.permute.xlu1 %v781_v45 }
 0x1df   : > { %425 = vperm.xlu1 %629, %v372_v36  }
 0x227   : > { %v402_v46 = vpop.permute.xlu2 %401 }
 0x228   : > { %v408_v59 = vmul.f32 %v402_v46, %v909_v2 }
 0x22f   : > { %v406_v47 = vpop.permute.xlu2 %405 }
 0x230   : > { %v409_v53 = vmul.f32 %v406_v47, %v923_v10 }
 0x238   : > { %v418_v50 = vpop.permute.xlu2 %417 }
 0x239   : > { %v421_v57 = vmul.f32 %v418_v50, %v925_v11 }
 0x23e   : > { %v414_v48 = vpop.permute.xlu1 %413  ;;  %v391_v49 = vpop.permute.xlu0 %390 }
 0x23f   : > { %v398_v55 = vmul.f32 %v391_v49, %v907_v1  ;;  %v420_v1 = vmul.f32 %v414_v48, %v911_v3 }
 0x241   : > { %v410_v63 = vadd.f32 %v408_v59, %v398_v55 }
 0x243   : > { %v422_v10 = vadd.f32 %v420_v1, %v410_v63 }
 0x247   : > { %v430_v56 = vpop.permute.xlu0 %429 }
 0x248   : > { %v396_v52 = vpop.permute.xlu1 %395  ;;  %v433_v62 = vmul.f32 %v430_v56, %v935_v19 }
 0x249   : > { %v399_v54 = vmul.f32 %v396_v52, %v921_v9 }
 0x24b   : > { %v411_v58 = vadd.f32 %v409_v53, %v399_v54 }
 0x24d   : > { %v423_v60 = vadd.f32 %v421_v57, %v411_v58 }
 0x24f   : > { %v435_v0 = vadd.f32 %v433_v62, %v423_v60 }
 0x251   : > { %v437_v9 = vmul.f32 %v435_v0, %v951_v61  ;;  %v426_v2 = vpop.permute.xlu1 %425 }
 0x252   : > { %v432_v11 = vmul.f32 %v426_v2, %v913_v4 }
 0x253   : > { %439 = vst [vmem:[%s179_s17 + $0x8] sm:$0xff] %v437_v9 }
 0x254   : > { %v434_v19 = vadd.f32 %v432_v11, %v422_v10 }
 0x256   : > { %v436_v5 = vmul.f32 %v434_v19, %v947_v51 }
 0x258   : > { %438 = vst [vmem:[%s179_s17] sm:$0xff] %v436_v5 }
 0x259   : > { %730 = shalt.err (!%p727_p8)
}
 0x25a   : > { %s782_s5 = smov 128   ;;  %s783_s6 = smov 8  }
 0x25b   : > { %565 = dma.vmem_to_hbm [thread:$0]  (%p851_p11), %s454_s24, 256, %s456_s13, %s441_s19, %s782_s5, %s782_s5, %s783_s6  }
 0x25c PF: > { %p582_p9 = scmp.ge.s32.totalorder %s773_s12, 2  ;;  %s470_s7 = sand.u32 1, %s761_s9  }
 0x25d   : > { %s471_s14 = scalar_lea.sflag [#allocation4], %s470_s7 }
 0x25e   : > { %p576_p10 = pnand %p582_p9, %p855_p12 }
 0x260   : > { %p577_p1 = pneg %p576_p10 }
 0x262   : > { %756 = dma.done.wait (%p577_p1), %s471_s14, 256  }
 0x263   : > { %758 = vsyncadd (%p577_p1), %s471_s14, 4294967040  ;;  %p16_p0 = scmp.ge.s32.totalorder %s824_s15, 6   ;;  %s1009_s9 = smov %s765_s10 }
 0x264   : > { %s1010_s10 = smov %s769_s11  ;;  %s1011_s11 = smov %s836_s18 }
 0x265   : > { %s1012_s12 = smov %s824_s15  ;;  %18 = sbr.rel (!%p16_p0) target bundleno = 6 (0x6), region = 78 }
 0x26a   :  { %477 = vsyncpa [#allocation3], 1 }
 0x26b   :  { %479 = vsyncpa [#allocation3 + $0x1], 1 }
 0x26c   :  { %480 = vsyncpa [#allocation6], 1 }
 0x26d   :  { %481 = vsyncpa [#allocation4], 1 }
 0x26e   :  { %483 = vsyncpa [#allocation4 + $0x1], 1 }

</bundles_post_ra>
